<compile_context>
chip_gen: v5e
topology: v5e:2x2
jax: 0.10.0
libtpu: 0.0.40
codegen_flags: <defaults>
</compile_context>

<pallas_src>
import functools

import jax
import jax.numpy as jnp
from jax.experimental import pallas as pl
from jax.experimental.pallas import tpu as pltpu

_EPS = 1e-12          # matches F.normalize(..., eps=1e-12)
_EPS2 = _EPS * _EPS   # clamp on the squared norm (max(||x||,eps)^2 == max(||x||^2,eps^2))


def _fewshot_kernel(scale_ref, ftest_ref, ftrain_ref, labels_ref, out_ref):
    # Per-grid-step blocks (bB meta-batch episodes at a time):
    #   scale_ref  : (1,)   in SMEM
    #   ftest_ref  : (bB, Nt,  C)
    #   ftrain_ref : (bB, Ntr, C)
    #   labels_ref : (bB, Ntr, K)   one-hot
    #   out_ref    : (bB, Nt,  K)
    ftrain = ftrain_ref[...].astype(jnp.float32)   # (bB, Ntr, C)
    labels = labels_ref[...].astype(jnp.float32)   # (bB, Ntr, K)
    ftest = ftest_ref[...].astype(jnp.float32)     # (bB, Nt,  C)
    scale = scale_ref[0]

    # F.normalize(features_train, p=2, dim=2, eps=1e-12) via EUP rsqrt.
    tr_inv = jax.lax.rsqrt(
        jnp.maximum(jnp.sum(ftrain * ftrain, axis=-1, keepdims=True), _EPS2))
    ftrain_n = ftrain * tr_inv

    # Prototypes: per-class sum of normalized train features.  The PyTorch
    # reference divides by per-class counts here; that per-row positive scalar
    # is cancelled by the L2 normalization below, so we skip it.
    protos = jnp.einsum("bnk,bnc->bkc", labels, ftrain_n,
                        preferred_element_type=jnp.float32)   # (bB, K, C)

    p_inv = jax.lax.rsqrt(
        jnp.maximum(jnp.sum(protos * protos, axis=-1, keepdims=True), _EPS2))
    protos_n = protos * p_inv                                  # (bB, K, C)

    # Normalize test features and fold scale_cls into the inverse norm so the
    # output tile needs no extra broadcast-multiply.
    te_inv = jax.lax.rsqrt(
        jnp.maximum(jnp.sum(ftest * ftest, axis=-1, keepdims=True), _EPS2))
    ftest_n = ftest * (scale * te_inv)                         # (bB, Nt, C)

    scores = jnp.einsum("btc,bkc->btk", ftest_n, protos_n,
                        preferred_element_type=jnp.float32)    # (bB, Nt, K)
    out_ref[...] = scores.astype(out_ref.dtype)


def _preprocess_5d_features(feats, global_pooling):
    # Glue equivalent of cutils.preprocess_5D_features (plain JAX).
    # TODO(synk): fuse the spatial average pool into the Pallas kernel (extra
    # H*W reduction axis) to avoid an extra HBM round trip on the 5-D path.
    if feats.ndim == 5:
        if global_pooling:
            feats = jnp.mean(feats, axis=(3, 4))   # adaptive_avg_pool2d(1)
        else:
            b, n = feats.shape[:2]
            feats = feats.reshape(b, n, -1)
    return feats


def _pick_block_b(B, Ntr, Nt, C, K, itemsize, max_bb=32, budget_bytes=4 << 20):
    """Episodes per grid step: as many as fit a modest VMEM budget (double-
    buffered by the pipeline), capped at max_bb."""
    per_ep = (Nt * C + Ntr * C + Ntr * K + Nt * K) * itemsize
    bb = min(max_bb, B, max(1, budget_bytes // max(per_ep, 1)))
    return max(1, bb)


@functools.partial(jax.jit, static_argnames=())
def _fewshot_forward(scale, features_test, features_train, labels_train):
    B, Ntr, C = features_train.shape
    _, Nt, _ = features_test.shape
    K = labels_train.shape[2]

    itemsize = max(features_train.dtype.itemsize, features_test.dtype.itemsize)
    bB = _pick_block_b(B, Ntr, Nt, C, K, itemsize)
    n_blocks = pl.cdiv(B, bB)
    Bpad = n_blocks * bB

    if Bpad != B:
        # Zero-padded episodes produce all-zero scores (no NaNs: counts
        # division was removed and norms are clamped); sliced off below.
        pad = Bpad - B
        features_train = jnp.pad(features_train, ((0, pad), (0, 0), (0, 0)))
        features_test = jnp.pad(features_test, ((0, pad), (0, 0), (0, 0)))
        labels_train = jnp.pad(labels_train, ((0, pad), (0, 0), (0, 0)))

    out_dtype = features_test.dtype

    out = pl.pallas_call(
        _fewshot_kernel,
        out_shape=jax.ShapeDtypeStruct((Bpad, Nt, K), out_dtype),
        grid=(n_blocks,),
        in_specs=[
            # scale_cls: scalar in SMEM (no per-step VMEM DMA).
            pl.BlockSpec(memory_space=pltpu.MemorySpace.SMEM),
            pl.BlockSpec((bB, Nt, C), lambda b: (b, 0, 0)),    # features_test
            pl.BlockSpec((bB, Ntr, C), lambda b: (b, 0, 0)),   # features_train
            pl.BlockSpec((bB, Ntr, K), lambda b: (b, 0, 0)),   # labels_train
        ],
        out_specs=pl.BlockSpec((bB, Nt, K), lambda b: (b, 0, 0)),
        compiler_params=pltpu.CompilerParams(
            dimension_semantics=("parallel",),
            vmem_limit_bytes=64 << 20,
        ),
    )(scale, features_test, features_train, labels_train)

    if Bpad != B:
        out = out[:B]
    return out


class FewShotClassifierWithPrototypes:
    """JAX/Pallas port of the PyTorch module (forward only, deterministic init)."""

    def __init__(self, global_pooling, scale_cls=10.0, learn_scale=True):
        self.global_pooling = global_pooling
        # nn.Parameter(torch.FloatTensor(1).fill_(scale_cls))
        # TODO(synk): learn_scale (trainable scale_cls) is not wired for
        # autodiff here; forward semantics only.
        self.scale_cls = jnp.full((1,), scale_cls, dtype=jnp.float32)

    def __call__(self, features_test, features_train, labels_train):
        features_train = _preprocess_5d_features(features_train, self.global_pooling)
        features_test = _preprocess_5d_features(features_test, self.global_pooling)
        assert features_train.ndim == 3
        assert features_test.ndim == 3
        # Inputs stay in their native dtype (bf16 in HBM halves read traffic);
        # the kernel casts to f32 internally for the math.
        return _fewshot_forward(self.scale_cls, features_test,
                                features_train, labels_train)


def _reference(features_test, features_train, labels_train, scale):
    # Pure-JAX reference mirroring the PyTorch forward (incl. counts division).
    ftr_n = features_train / jnp.maximum(
        jnp.linalg.norm(features_train, axis=2, keepdims=True), _EPS)
    protos = jnp.einsum("bnk,bnc->bkc", labels_train, ftr_n)
    protos = protos / jnp.sum(labels_train, axis=1)[..., None]
    protos_n = protos / jnp.maximum(
        jnp.linalg.norm(protos, axis=2, keepdims=True), _EPS)
    ft_n = features_test / jnp.maximum(
        jnp.linalg.norm(features_test, axis=2, keepdims=True), _EPS)
    return scale * jnp.einsum("btc,bkc->btk", ft_n, protos_n)


if __name__ == "__main__":
    key = jax.random.PRNGKey(0)
    B, Ntr, Nt, C, K = 2, 8, 8, 32, 4  # meta-batch, train-shots, test, channels, novel classes

    k1, k2 = jax.random.split(key)
    features_train = jax.random.normal(k1, (B, Ntr, C), dtype=jnp.float32)
    features_test = jax.random.normal(k2, (B, Nt, C), dtype=jnp.float32)

    # 2 shots per class, one-hot labels: [0,1,2,3,0,1,2,3] per meta-batch element.
    class_ids = jnp.tile(jnp.arange(K, dtype=jnp.int32), Ntr // K)
    labels_train = jnp.broadcast_to(
        jax.nn.one_hot(class_ids, K, dtype=jnp.float32), (B, Ntr, K))

    clf = FewShotClassifierWithPrototypes(global_pooling=True,
                                          scale_cls=10.0, learn_scale=True)
    scores = clf(features_test, features_train, labels_train)
    scores = jax.block_until_ready(scores)

    expected = _reference(features_test, features_train, labels_train, 10.0)
    assert scores.shape == (B, Nt, K)
    assert jnp.allclose(scores, expected, atol=1e-3, rtol=1e-4), \
        f"max abs err {jnp.max(jnp.abs(scores - expected))}"
    print("KERNEL_OK")
</pallas_src>

<mosaic_0001>
module attributes {stable_mosaic.version = 11 : i64} {
  func.func @_fewshot_kernel(%arg0: i32, %arg1: memref<1xf32, #tpu.memory_space<smem>>, %arg2: memref<2x8x32xf32, #tpu.memory_space<vmem>>, %arg3: memref<2x8x32xf32, #tpu.memory_space<vmem>>, %arg4: memref<2x8x4xf32, #tpu.memory_space<vmem>>, %arg5: memref<2x8x4xf32, #tpu.memory_space<vmem>>) attributes {dimension_semantics = [#tpu.dimension_semantics<parallel>], iteration_bounds = array<i64: 1>, scalar_prefetch = 0 : i64, scratch_operands = 0 : i64, tpu.core_type = #tpu.core_type<tc>, window_params = [{transform_indices = @transform_0, window_bounds = array<i64: 1>}, {transform_indices = @transform_1, window_bounds = array<i64: 2, 8, 32>}, {transform_indices = @transform_2, window_bounds = array<i64: 2, 8, 32>}, {transform_indices = @transform_3, window_bounds = array<i64: 2, 8, 4>}, {transform_indices = @transform_4, window_bounds = array<i64: 2, 8, 4>}]} {
    %c0 = arith.constant 0 : index
    %c0_0 = arith.constant 0 : index
    %c0_1 = arith.constant 0 : index
    %0 = vector.load %arg3[%c0, %c0_0, %c0_1] : memref<2x8x32xf32, #tpu.memory_space<vmem>>, vector<2x8x32xf32>
    %c0_2 = arith.constant 0 : index
    %c0_3 = arith.constant 0 : index
    %c0_4 = arith.constant 0 : index
    %1 = vector.load %arg4[%c0_2, %c0_3, %c0_4] : memref<2x8x4xf32, #tpu.memory_space<vmem>>, vector<2x8x4xf32>
    %c0_5 = arith.constant 0 : index
    %c0_6 = arith.constant 0 : index
    %c0_7 = arith.constant 0 : index
    %2 = vector.load %arg2[%c0_5, %c0_6, %c0_7] : memref<2x8x32xf32, #tpu.memory_space<vmem>>, vector<2x8x32xf32>
    %c0_8 = arith.constant 0 : index
    %3 = memref.load %arg1[%c0_8] : memref<1xf32, #tpu.memory_space<smem>>
    %4 = arith.mulf %0, %0 : vector<2x8x32xf32>
    %cst = arith.constant dense<0.000000e+00> : vector<2x8xf32>
    %5 = vector.multi_reduction <add>, %4, %cst [2] : vector<2x8x32xf32> to vector<2x8xf32>
    %6 = vector.shape_cast %5 : vector<2x8xf32> to vector<2x8x1xf32>
    %cst_9 = arith.constant 1.000000e-24 : f32
    %7 = vector.broadcast %cst_9 : f32 to vector<2x8x1xf32>
    %8 = arith.maximumf %6, %7 : vector<2x8x1xf32>
    %9 = math.rsqrt %8 : vector<2x8x1xf32>
    %10 = vector.broadcast %9 : vector<2x8x1xf32> to vector<2x8x32xf32>
    %11 = arith.mulf %0, %10 : vector<2x8x32xf32>
    "tpu.trace_start"() <{level = 10 : i32, message = "bnk,bnc->bkc"}> : () -> ()
    %cst_10 = arith.constant dense<0.000000e+00> : vector<2x4x32xf32>
    %12 = tpu.matmul %1, %11, %cst_10 {dimension_numbers = #tpu.dot_dimension_numbers<[1], [1], [2], [2], [0, 0, 0, 2, 1, 2], [0], [0]>} : vector<2x8x4xf32>, vector<2x8x32xf32>, vector<2x4x32xf32> -> vector<2x4x32xf32>
    "tpu.trace_stop"() : () -> ()
    %13 = arith.mulf %12, %12 : vector<2x4x32xf32>
    %cst_11 = arith.constant dense<0.000000e+00> : vector<2x4xf32>
    %14 = vector.multi_reduction <add>, %13, %cst_11 [2] : vector<2x4x32xf32> to vector<2x4xf32>
    %15 = vector.shape_cast %14 : vector<2x4xf32> to vector<2x4x1xf32>
    %cst_12 = arith.constant 1.000000e-24 : f32
    %16 = vector.broadcast %cst_12 : f32 to vector<2x4x1xf32>
    %17 = arith.maximumf %15, %16 : vector<2x4x1xf32>
    %18 = math.rsqrt %17 : vector<2x4x1xf32>
    %19 = vector.broadcast %18 : vector<2x4x1xf32> to vector<2x4x32xf32>
    %20 = arith.mulf %12, %19 : vector<2x4x32xf32>
    %21 = arith.mulf %2, %2 : vector<2x8x32xf32>
    %cst_13 = arith.constant dense<0.000000e+00> : vector<2x8xf32>
    %22 = vector.multi_reduction <add>, %21, %cst_13 [2] : vector<2x8x32xf32> to vector<2x8xf32>
    %23 = vector.shape_cast %22 : vector<2x8xf32> to vector<2x8x1xf32>
    %cst_14 = arith.constant 1.000000e-24 : f32
    %24 = vector.broadcast %cst_14 : f32 to vector<2x8x1xf32>
    %25 = arith.maximumf %23, %24 : vector<2x8x1xf32>
    %26 = math.rsqrt %25 : vector<2x8x1xf32>
    %27 = vector.broadcast %3 : f32 to vector<2x8x1xf32>
    %28 = arith.mulf %27, %26 : vector<2x8x1xf32>
    %29 = vector.broadcast %28 : vector<2x8x1xf32> to vector<2x8x32xf32>
    %30 = arith.mulf %2, %29 : vector<2x8x32xf32>
    "tpu.trace_start"() <{level = 10 : i32, message = "btc,bkc->btk"}> : () -> ()
    %cst_15 = arith.constant dense<0.000000e+00> : vector<2x8x4xf32>
    %31 = tpu.matmul %30, %20, %cst_15 {dimension_numbers = #tpu.dot_dimension_numbers<[2], [2], [1], [1], [0, 0, 0, 1, 1, 1], [0], [0]>} : vector<2x8x32xf32>, vector<2x4x32xf32>, vector<2x8x4xf32> -> vector<2x8x4xf32>
    "tpu.trace_stop"() : () -> ()
    %c0_16 = arith.constant 0 : index
    %c0_17 = arith.constant 0 : index
    %c0_18 = arith.constant 0 : index
    %32 = vector.load %arg5[%c0_16, %c0_17, %c0_18] : memref<2x8x4xf32, #tpu.memory_space<vmem>>, vector<2x8x4xf32>
    tpu.vector_store %arg5[%c0_16, %c0_17, %c0_18], %31 {strides = array<i32>} : memref<2x8x4xf32, #tpu.memory_space<vmem>>, vector<2x8x4xf32>,
    return
  }
  func.func @transform_0(%arg0: i32) -> i32 {
    %c0_i32 = arith.constant 0 : i32
    %c0_i32_0 = arith.constant 0 : i32
    return %c0_i32 : i32
  }
  func.func @transform_1(%arg0: i32) -> (i32, i32, i32) {
    %c0_i32 = arith.constant 0 : i32
    %c0_i32_0 = arith.constant 0 : i32
    %c0_i32_1 = arith.constant 0 : i32
    return %arg0, %c0_i32, %c0_i32_0 : i32, i32, i32
  }
  func.func @transform_2(%arg0: i32) -> (i32, i32, i32) {
    %c0_i32 = arith.constant 0 : i32
    %c0_i32_0 = arith.constant 0 : i32
    %c0_i32_1 = arith.constant 0 : i32
    return %arg0, %c0_i32, %c0_i32_0 : i32, i32, i32
  }
  func.func @transform_3(%arg0: i32) -> (i32, i32, i32) {
    %c0_i32 = arith.constant 0 : i32
    %c0_i32_0 = arith.constant 0 : i32
    %c0_i32_1 = arith.constant 0 : i32
    return %arg0, %c0_i32, %c0_i32_0 : i32, i32, i32
  }
  func.func @transform_4(%arg0: i32) -> (i32, i32, i32) {
    %c0_i32 = arith.constant 0 : i32
    %c0_i32_0 = arith.constant 0 : i32
    %c0_i32_1 = arith.constant 0 : i32
    return %arg0, %c0_i32, %c0_i32_0 : i32, i32, i32
  }
}

</mosaic_0001>

<bundles_post_ra>
// kernel: _fewshot_forward.1
= control target key start
LH: loop header
LB: loop body
LE: loop exit
PB: predicated region body
PF: predicated region fallthrough
CT: control target
= control target key end

     0   :  { %10 = vsyncpa [#allocation4], 0  ;;  %s361_s18 = smov [#allocation3]   ;;  %s362_s20 = smov 128   ;;  %s442_s0 = inlined_call_operand.<no memory space> [shape: f32[1], index: 0, kind: input, shape index: {}]   ;;  %s443_s1 = inlined_call_operand.vmem [shape: f32[2,8,32], index: 1, kind: input, shape index: {}]   ;;  %s444_s2 = inlined_call_operand.hbm [shape: f32[2,8,32], index: 2, kind: input, shape index: {}]   ;;  %s445_s3 = inlined_call_operand.vmem [shape: f32[2,8,4], index: 3, kind: input, shape index: {}]   ;;  %s446_s4 = inlined_call_operand.vmem [shape: f32[2,8,4], index: 4, kind: output, shape index: {}]  }
   0x1   :  { %s19_s17 = sshll.u32 %s444_s2, 4  ;;  %s21_s19 = sshll.u32 %s361_s18, 4  ;;  %s20_s17 = int_to_ptr.hbm [resolvable:$true] %s19_s17  ;;  %s22_s19 = int_to_ptr.vmem [resolvable:$true] %s21_s19 }
   0x2   :  { %s363_s21 = smov 8  }
   0x3   :  { %27 = dma.hbm_to_vmem [thread:$0]  %s20_s17, 256, %s22_s19, [#allocation4], %s362_s20, %s362_s20, %s363_s21  }
   0x4   :  { %359 = dma.done.wait [#allocation4], 256  }
   0x5   :  { %360 = vsyncadd [#allocation4], 4294967040  ;;  %v36_v0 = vld [vmem:[%s445_s3] sm:$0xff]  ;;  %vm43_vm0 = vcmask 261120   ;;  %v35_v3 = vld [vmem:[#allocation3 + $0x8] sm:$0xff]  ;;  %vm106_vm7 = vcmask 64512  }
   0x6   :  { %v34_v1 = vld [vmem:[#allocation3] sm:$0xff]  ;;  %74 = vxpose.xlu1.b32.start.end [1/1] (short) (narrow) %v36_v0, 8  ;;  %v42_v5 = vmul.f32 %v35_v3, %v35_v3  ;;  %v37_v6 = vld [vmem:[%s445_s3 + $0x8] sm:$0xff]  ;;  %vm187_vm8 = vcmask 257024  }
   0x7   :  { %v41_v2 = vmul.f32 %v34_v1, %v34_v1  ;;  %v403_v24 = vld [vmem:[%s443_s1 + $0x8] sm:$0xff]  ;;  %v408_v25 = vld [vmem:[%s443_s1] sm:$0xff] }
   0x8   :  { %v47_v7 = vsel %vm43_vm0, %v42_v5, 0.0  ;;  %v219_v27 = vmul.f32 %v403_v24, %v403_v24  ;;  %v218_v28 = vmul.f32 %v408_v25, %v408_v25  ;;  %v248_v5 = vstv %s442_s0 }
   0x9   :  { %v44_v4 = vsel %vm43_vm0, %v41_v2, 0.0 }
   0xa   :  { %45 = vadd.xlane.f32.xlu0 %v44_v4  ;;  %v223_v30 = vsel %vm43_vm0, %v219_v27, 0.0  ;;  %v220_v31 = vsel %vm43_vm0, %v218_v28, 0.0 }
   0xe   :  { %130 = vxpose.xlu1.b32.start.end [1/1] (short) (narrow) %v37_v6, 8 }
  0x12   :  { %48 = vadd.xlane.f32.xlu0 %v47_v7 }
  0x1a   :  { %221 = vadd.xlane.f32.xlu0 %v220_v31 }
  0x6e   :  { %224 = vadd.xlane.f32.xlu1 %v223_v30 }
  0x7d   :  { %v46_v8 = vpop.xlane.xlu0 %45 }
  0x7e   :  { %v50_v9 = vmax.f32 %v46_v8, 1e-24 }
  0x80   :  { %323 = vrsqrt.f32 %v50_v9  ;;  %vm58_vm1 = vweird.f32 %v50_v9 }
  0x85   :  { %v49_v10 = vpop.xlane.xlu0 %48 }
  0x86   :  { %v324_v11 = vpop.eup %323  ;;  %v51_v12 = vmax.f32 %v49_v10, 1e-24 }
  0x87   :  { %v53_v13 = vmul.f32 %v324_v11, %v50_v9  ;;  %vm59_vm2 = vweird.f32 %v324_v11 }
  0x88   :  { %325 = vrsqrt.f32 %v51_v12  ;;  %vm60_vm3 = vmor %vm58_vm1, %vm59_vm2  ;;  %vm68_vm4 = vweird.f32 %v51_v12 }
  0x89   :  { %v54_v14 = vmul.f32 %v324_v11, %v53_v13 }
  0x8b   :  { %v55_v15 = vmul.f32 0.5, %v54_v14 }
  0x8d   :  { %v56_v16 = vsub.f32 1.5, %v55_v15  ;;  %v222_v42 = vpop.xlane.xlu0 %221 }
  0x8e   :  { %v326_v17 = vpop.eup %325  ;;  %v226_v43 = vmax.f32 %v222_v42, 1e-24 }
  0x8f   :  { %v63_v18 = vmul.f32 %v326_v17, %v51_v12  ;;  %v57_v19 = vmul.f32 %v324_v11, %v56_v16  ;;  %vm69_vm5 = vweird.f32 %v326_v17 }
  0x90   :  { %vm70_vm6 = vmor %vm68_vm4, %vm69_vm5  ;;  %327 = vrsqrt.f32 %v226_v43  ;;  %vm234_vm9 = vweird.f32 %v226_v43 }
  0x91   :  { %v64_v20 = vmul.f32 %v326_v17, %v63_v18  ;;  %v61_v21 = vsel %vm60_vm3, %v324_v11, %v57_v19 }
  0x92   :  { %v72_v22 = vmul.f32 %v61_v21, %v34_v1 }
  0x93   :  { %v65_v23 = vmul.f32 0.5, %v64_v20 }
  0x94   :  { %125 = vmatpush.msra.mxu0 %v72_v22 }
  0x95   :  { %v66_v26 = vsub.f32 1.5, %v65_v23 }
  0x96   :  { %v328_v46 = vpop.eup %327 }
  0x97   :  { %v67_v29 = vmul.f32 %v326_v17, %v66_v26  ;;  %v229_v47 = vmul.f32 %v328_v46, %v226_v43  ;;  %vm235_vm10 = vweird.f32 %v328_v46 }
  0x98   :  { %vm420_vm11 = vmor %vm234_vm9, %vm235_vm10 }
  0x99   :  { %v71_v32 = vsel %vm70_vm6, %v326_v17, %v67_v29  ;;  %v230_v49 = vmul.f32 %v328_v46, %v229_v47  ;;  %vm305_vm6 = vcmask 31744  }
  0x9a   :  { %v73_v33 = vmul.f32 %v71_v32, %v35_v3 }
  0x9b   :  { %v231_v53 = vmul.f32 0.5, %v230_v49 }
  0x9c   :  { %180 = vmatpush.msra.mxu1 %v73_v33 }
  0x9d   :  { %v232_v57 = vsub.f32 1.5, %v231_v53 }
  0x9f   :  { %v233_v62 = vmul.f32 %v328_v46, %v232_v57 }
  0xa1   :  { %v237_v4 = vsel %vm420_vm11, %v328_v46, %v233_v62 }
  0xa2   :  { %v249_v10 = vmul.f32 %v248_v5, %v237_v4 }
  0xa4   :  { %v251_v15 = vmul.f32 %v249_v10, %v408_v25 }
  0xaa   :  { %v90_v34 = vpop.trf.xlu1 }
  0xab   :  { %313 = vmatmul.msk.f32.vlgmr.msra.gmra.mxu0 %vm106_vm7, %v90_v34 }
  0xb2   :  { %v146_v35 = vpop.trf.xlu1 }
  0xb3   :  { %314 = vmatmul.msk.f32.vlgmr.msra.gmra.mxu1 %vm106_vm7, %v146_v35 }
  0xe1   :  { %v225_v44 = vpop.xlane.xlu1 %224 }
  0xe2   :  { %v227_v45 = vmax.f32 %v225_v44, 1e-24 }
  0xe4   :  { %329 = vrsqrt.f32 %v227_v45  ;;  %vm244_vm14 = vweird.f32 %v227_v45 }
  0xea   :  { %v330_v51 = vpop.eup %329 }
  0xeb   :  { %v239_v52 = vmul.f32 %v330_v51, %v227_v45  ;;  %vm245_vm15 = vweird.f32 %v330_v51 }
  0xec   :  { %vm246_vm2 = vmor %vm244_vm14, %vm245_vm15 }
  0xed   :  { %v240_v56 = vmul.f32 %v330_v51, %v239_v52 }
  0xef   :  { %v241_v61 = vmul.f32 0.5, %v240_v56 }
  0xf1   :  { %v242_v3 = vsub.f32 1.5, %v241_v61 }
  0xf3   :  { %v243_v11 = vmul.f32 %v330_v51, %v242_v3 }
  0xf5   :  { %v247_v16 = vsel %vm246_vm2, %v330_v51, %v243_v11 }
  0xf6   :  { %v250_v19 = vmul.f32 %v248_v5, %v247_v16 }
  0xf8   :  { %v252_v21 = vmul.f32 %v250_v19, %v403_v24 }
 0x128   :  { %v127_v36 = vpop.f32.mrf.mxu0 }
 0x129   :  { %v185_v37 = vmul.f32 %v127_v36, %v127_v36 }
 0x12b   :  { %v188_v38 = vsel %vm187_vm8, %v185_v37, 0.0 }
 0x12c   :  { %189 = vadd.xlane.f32.xlu2 %v188_v38 }
 0x130   :  { %v416_v39 = vpop.f32.mrf.mxu1 }
 0x131   :  { %v186_v40 = vmul.f32 %v416_v39, %v416_v39 }
 0x133   :  { %v191_v41 = vsel %vm187_vm8, %v186_v40, 0.0 }
 0x134   :  { %192 = vadd.xlane.f32.xlu2 %v191_v41 }
 0x19f   :  { %v190_v48 = vpop.xlane.xlu2 %189 }
 0x1a0   :  { %v194_v50 = vmax.f32 %v190_v48, 1e-24 }
 0x1a2   :  { %331 = vrsqrt.f32 %v194_v50  ;;  %vm202_vm13 = vweird.f32 %v194_v50 }
 0x1a7   :  { %v193_v54 = vpop.xlane.xlu2 %192 }
 0x1a8   :  { %v332_v55 = vpop.eup %331  ;;  %v195_v58 = vmax.f32 %v193_v54, 1e-24 }
 0x1a9   :  { %v197_v59 = vmul.f32 %v332_v55, %v194_v50  ;;  %vm203_vm12 = vweird.f32 %v332_v55 }
 0x1aa   :  { %333 = vrsqrt.f32 %v195_v58  ;;  %vm204_vm1 = vmor %vm202_vm13, %vm203_vm12  ;;  %vm212_vm4 = vweird.f32 %v195_v58 }
 0x1ab   :  { %v198_v60 = vmul.f32 %v332_v55, %v197_v59 }
 0x1ad   :  { %v199_v0 = vmul.f32 0.5, %v198_v60 }
 0x1af   :  { %v200_v1 = vsub.f32 1.5, %v199_v0 }
 0x1b0   :  { %v334_v2 = vpop.eup %333 }
 0x1b1   :  { %v207_v6 = vmul.f32 %v334_v2, %v195_v58  ;;  %v201_v7 = vmul.f32 %v332_v55, %v200_v1  ;;  %vm213_vm3 = vweird.f32 %v334_v2 }
 0x1b2   :  { %vm214_vm5 = vmor %vm212_vm4, %vm213_vm3 }
 0x1b3   :  { %v208_v8 = vmul.f32 %v334_v2, %v207_v6  ;;  %v205_v9 = vsel %vm204_vm1, %v332_v55, %v201_v7 }
 0x1b4   :  { %v216_v12 = vmul.f32 %v205_v9, %v127_v36 }
 0x1b5   :  { %v209_v13 = vmul.f32 0.5, %v208_v8 }
 0x1b6   :  { %315 = vmatpush.xpose.msk.msra.mxu2 %vm43_vm0, %v216_v12 }
 0x1b7   :  { %v210_v14 = vsub.f32 1.5, %v209_v13 }
 0x1b9   :  { %316 = vmatmul.msk.f32.vlgmr.msra.gmra.mxu2 %vm43_vm0, %v251_v15  ;;  %v211_v17 = vmul.f32 %v334_v2, %v210_v14 }
 0x1bb   :  { %v215_v18 = vsel %vm214_vm5, %v334_v2, %v211_v17 }
 0x1bc   :  { %v217_v20 = vmul.f32 %v215_v18, %v416_v39 }
 0x1be   :  { %317 = vmatpush.xpose.msk.msra.mxu3 %vm43_vm0, %v217_v20 }
 0x1c1   :  { %318 = vmatmul.msk.f32.vlgmr.msra.gmra.mxu3 %vm43_vm0, %v252_v21 }
 0x23c   :  { %v276_v22 = vpop.f32.mrf.mxu2 }
 0x23d   :  { %306 = vst.msk [vmem:[%s446_s4] sm:$0xff] %vm305_vm6, %v276_v22 }
 0x244   :  { %v302_v23 = vpop.f32.mrf.mxu3 }
 0x245   :  { %307 = vst.msk [vmem:[%s446_s4 + $0x8] sm:$0xff] %vm305_vm6, %v302_v23 }
 0x246   :  { %312 = vsyncpa [#allocation4], 1 }

</bundles_post_ra>
